<compile_context>
chip_gen: v7x
topology: tpu7x:2x2x1
jax: 0.10.0
libtpu: 0.0.40
codegen_flags: <defaults>
</compile_context>

<pallas_src>
import functools

import jax
import jax.numpy as jnp
from jax.experimental import pallas as pl
from jax.experimental.pallas import tpu as pltpu

KW = 4          # conv kernel size
STRIDE = 2
PAD = 2         # int(ceil((4 - 1) / 2)), matches the PyTorch module
LEAK = 0.2
IN_EPS = 1e-5   # nn.InstanceNorm2d default eps


def _round_up(x, m):
    return ((x + m - 1) // m) * m


# ---------------------------------------------------------------------------
# Conv (+ InstanceNorm) + LeakyReLU kernel.  One grid step = TN whole samples.
# ---------------------------------------------------------------------------
def _conv_block_kernel(patch_ref, w_ref, b_ref, out_ref, *, do_norm, tn, p, p_pad):
    x = patch_ref[...]                                                    # (R, K) bf16
    acc = jnp.dot(x, w_ref[...], preferred_element_type=jnp.float32)      # (R, Cout) f32

    if do_norm:
        # InstanceNorm2d(affine=False): per-(sample, channel) stats over the P real
        # spatial rows of each of the TN samples in this block.  The conv bias is
        # skipped here because the mean subtraction cancels it exactly.
        r = tn * p_pad
        # sel[t, j]  = 1 iff row j is a real (non-padded) row of sample t
        col = jax.lax.broadcasted_iota(jnp.int32, (tn, r), 1)
        row = jax.lax.broadcasted_iota(jnp.int32, (tn, r), 0)
        off = col - row * p_pad
        sel = jnp.logical_and(off >= 0, off < p).astype(jnp.float32)      # (TN, R)
        # selT is the same selector built transposed (avoids in-kernel transpose)
        rowT = jax.lax.broadcasted_iota(jnp.int32, (r, tn), 0)
        colT = jax.lax.broadcasted_iota(jnp.int32, (r, tn), 1)
        offT = rowT - colT * p_pad
        selT = jnp.logical_and(offT >= 0, offT < p).astype(jnp.float32)   # (R, TN)

        inv_p = 1.0 / p
        mean = jnp.dot(sel, acc, preferred_element_type=jnp.float32) * inv_p        # (TN, Cout)
        ex2 = jnp.dot(sel, acc * acc, preferred_element_type=jnp.float32) * inv_p   # (TN, Cout)
        inv_std = jax.lax.rsqrt(ex2 - mean * mean + IN_EPS)                          # (TN, Cout)
        # Broadcast per-sample stats back to their rows via (R, TN) @ (TN, Cout).
        mean_r = jnp.dot(selT, mean, preferred_element_type=jnp.float32)             # (R, Cout)
        inv_r = jnp.dot(selT, inv_std, preferred_element_type=jnp.float32)           # (R, Cout)
        acc = (acc - mean_r) * inv_r
    else:
        acc = acc + b_ref[...]

    out_ref[...] = jnp.maximum(acc, LEAK * acc)                           # LeakyReLU(0.2)


def _pick_sample_tile(n, p_pad, k, cout_p):
    """Samples per grid step: target >= 256 matmul rows, keep >= 2 grid steps when
    possible (v7x has 2 TensorCores), stay well under v7x's 64 MiB VMEM, divide N."""
    tn = max(1, min(n, -(-256 // p_pad)))
    if n >= 2 and n // tn < 2:
        tn = max(1, n // 2)

    def need(t):
        r = t * p_pad
        return 2 * (r * k * 2 + r * cout_p * 4) + 2 * (k * cout_p * 2 + cout_p * 4)

    while tn > 1 and need(tn) > (24 << 20):
        tn -= 1
    while n % tn != 0:
        tn -= 1
    return tn


def im2col(x):
    """x: (N, H, W, C) -> patches (N, OH*OW, KW*KW*C), plus OH, OW."""
    n, h, w, c = x.shape
    oh = (h + 2 * PAD - KW) // STRIDE + 1
    ow = (w + 2 * PAD - KW) // STRIDE + 1
    xp = jnp.pad(x, ((0, 0), (PAD, PAD), (PAD, PAD), (0, 0)))
    cols = []
    for kh in range(KW):
        for kw in range(KW):
            sl = xp[:, kh:kh + STRIDE * (oh - 1) + 1:STRIDE,
                       kw:kw + STRIDE * (ow - 1) + 1:STRIDE, :]           # (N, OH, OW, C)
            cols.append(sl)
    patches = jnp.stack(cols, axis=3)                                     # (N, OH, OW, 16, C)
    return patches.reshape(n, oh * ow, KW * KW * c), oh, ow


def conv_lrelu_layer(x, w_flat, bias, do_norm, cout):
    """x: (N, H, W, Cin) f32.  w_flat: (KW*KW*Cin, Cout_pad) bf16.  bias: (1, Cout_pad) f32."""
    # NOTE: im2col patches are still materialized in HBM (bf16 halves that traffic);
    # fusing patch construction into the kernel is the remaining optimization headroom.
    patches, oh, ow = im2col(x)
    n, p, k = patches.shape
    cout_p = w_flat.shape[1]
    p_pad = _round_up(p, 16)                        # sublane-align rows (bf16 packs 16/vreg)
    patches = jnp.pad(patches, ((0, 0), (0, p_pad - p), (0, 0)))
    patches = patches.astype(jnp.bfloat16).reshape(n * p_pad, k)

    tn = _pick_sample_tile(n, p_pad, k, cout_p)
    r = tn * p_pad
    grid = n // tn
    vmem_need = 2 * (r * k * 2 + r * cout_p * 4) + 2 * (k * cout_p * 2 + cout_p * 4)
    vmem_limit = int(max(vmem_need + (8 << 20), 16 << 20))   # derived, stays << 64 MiB (v7x)

    out = pl.pallas_call(
        functools.partial(_conv_block_kernel, do_norm=do_norm, tn=tn, p=p, p_pad=p_pad),
        out_shape=jax.ShapeDtypeStruct((n * p_pad, cout_p), jnp.float32),
        grid_spec=pltpu.PrefetchScalarGridSpec(
            num_scalar_prefetch=0,
            grid=(grid,),
            in_specs=[
                pl.BlockSpec((r, k), lambda i: (i, 0)),
                pl.BlockSpec((k, cout_p), lambda i: (0, 0)),
                pl.BlockSpec((1, cout_p), lambda i: (0, 0)),
            ],
            out_specs=pl.BlockSpec((r, cout_p), lambda i: (i, 0)),
        ),
        compiler_params=pltpu.CompilerParams(
            dimension_semantics=("parallel",),
            vmem_limit_bytes=vmem_limit,
        ),
    )(patches, w_flat, bias)

    out = out.reshape(n, p_pad, cout_p)[:, :p, :cout]   # drop row padding + lane padding
    return out.reshape(n, oh, ow, cout)


# ---------------------------------------------------------------------------
# Tail kernel: spatial sum -> spectral-norm FC -> cosine sim -> softmax ->
#              gather(y) -> masked "mean" (faithful to the PyTorch broadcast).
# Tiled over samples; (1,1) output block is resident and accumulated across steps.
# ---------------------------------------------------------------------------
def _tail_kernel(feat_ref, wfc_ref, bfc_ref, ly_ref, lyn_ref, onehot_ref, mask_ref,
                 out_ref, picked_acc, mask_acc):
    step = pl.program_id(0)

    @pl.when(step == 0)
    def _():
        picked_acc[...] = jnp.zeros_like(picked_acc)
        mask_acc[...] = jnp.zeros_like(mask_acc)

    obj = jnp.sum(feat_ref[...], axis=1)                                  # (TB, Cf) spatial sum
    f = jnp.dot(obj.astype(jnp.bfloat16), wfc_ref[...],
                preferred_element_type=jnp.float32) + bfc_ref[...]        # (TB, 128)

    ly = ly_ref[...]                                                      # (C, 128)
    dots = jax.lax.dot_general(f, ly, (((1,), (1,)), ((), ())),
                               preferred_element_type=jnp.float32)        # (TB, C)
    fn = jnp.sqrt(jnp.sum(f * f, axis=1, keepdims=True))                  # (TB, 1)
    cos = dots / jnp.maximum(fn * lyn_ref[...], 1e-6)                     # CosineSimilarity(eps=1e-6)

    m = jnp.max(cos, axis=1, keepdims=True)                               # softmax over classes
    e = jnp.exp(cos - m)
    sm = e / jnp.sum(e, axis=1, keepdims=True)

    picked = jnp.sum(sm * onehot_ref[...], axis=1, keepdims=True)         # == loss[arange, y]
    picked_acc[...] += picked
    mask_acc[...] += mask_ref[...]

    # NOTE: reproduces the PyTorch broadcast of (N,) * (N,1) -> (N,N) before the sum:
    #   sum_{i,j} picked[j] * mask[i] == sum(picked) * sum(mask)
    sp = jnp.sum(picked_acc[...], axis=0, keepdims=True)                  # (1, 1)
    sm_tot = jnp.sum(mask_acc[...], axis=0, keepdims=True)                # (1, 1)
    out_ref[...] = sp * sm_tot / (sm_tot + 1e-6)


def _pick_tail_tile(n):
    # Block second-minor dims must be 8-aligned or span the full array.
    if n % 8 != 0:
        return n
    tb = 8
    for cand in (16, 32, 64, 128):
        if n % cand == 0:
            tb = cand
    return tb


def tail_loss(feat, y, params, instance_threshold):
    n, p_last, cf = feat.shape
    c = params["l_y"].shape[0]
    yv = y.reshape(n).astype(jnp.int32)
    onehot = (yv[:, None] == jnp.arange(c, dtype=jnp.int32)[None, :]).astype(jnp.float32)
    mask = (jnp.logical_and(yv > 0, yv < instance_threshold)
            .astype(jnp.float32).reshape(n, 1))

    tb = _pick_tail_tile(n)
    grid = n // tb
    wfc = params["w_fc"]

    out = pl.pallas_call(
        _tail_kernel,
        out_shape=jax.ShapeDtypeStruct((1, 1), jnp.float32),
        grid_spec=pltpu.PrefetchScalarGridSpec(
            num_scalar_prefetch=0,
            grid=(grid,),
            in_specs=[
                pl.BlockSpec((tb, p_last, cf), lambda i: (i, 0, 0)),
                pl.BlockSpec(wfc.shape, lambda i: (0, 0)),
                pl.BlockSpec((1, 128), lambda i: (0, 0)),
                pl.BlockSpec((c, 128), lambda i: (0, 0)),
                pl.BlockSpec((1, c), lambda i: (0, 0)),
                pl.BlockSpec((tb, c), lambda i: (i, 0)),
                pl.BlockSpec((tb, 1), lambda i: (i, 0)),
            ],
            out_specs=pl.BlockSpec((1, 1), lambda i: (0, 0)),
            scratch_shapes=[pltpu.VMEM((tb, 1), jnp.float32),
                            pltpu.VMEM((tb, 1), jnp.float32)],
        ),
        compiler_params=pltpu.CompilerParams(
            dimension_semantics=("arbitrary",),
        ),
    )(feat, wfc, params["b_fc"], params["l_y"], params["lyn"], onehot, mask)
    return out[0, 0]


# ---------------------------------------------------------------------------
# Parameter setup + forward wrapper
# ---------------------------------------------------------------------------
def spectral_normalize(w, key, n_iters=8):
    """nn.utils.spectral_norm: divide weight by its largest singular value (power iter)."""
    u = jax.random.normal(key, (w.shape[0],), jnp.float32)
    u = u / (jnp.linalg.norm(u) + 1e-12)
    v = None
    for _ in range(n_iters):
        v = w.T @ u
        v = v / (jnp.linalg.norm(v) + 1e-12)
        u = w @ v
        u = u / (jnp.linalg.norm(u) + 1e-12)
    sigma = u @ (w @ v)
    return w / sigma


def init_params(key, num_classes, ndf=64, n_layers=4):
    keys = jax.random.split(key, 2 * n_layers + 4)
    convs = []
    cin, cout = 1, ndf
    ki = 0
    for n in range(n_layers):
        # torch weight (Cout, Cin, KH, KW) laid out here as (KH, KW, Cin, Cout)
        w = jax.random.normal(keys[ki], (KW, KW, cin, cout), jnp.float32) * 0.05
        b = jax.random.normal(keys[ki + 1], (1, cout), jnp.float32) * 0.05
        cout_p = _round_up(cout, 128)                  # lane-dense output stores
        w_flat = jnp.pad(w.reshape(KW * KW * cin, cout),
                         ((0, 0), (0, cout_p - cout))).astype(jnp.bfloat16)
        bias = jnp.pad(b, ((0, 0), (0, cout_p - cout)))
        convs.append((w_flat, bias, n > 0, cout))      # InstanceNorm on layers 1..n-1
        ki += 2
        cin, cout = cout, min(cout * 2, 512)
    nf = cin
    w_fc = jax.random.normal(keys[ki], (128, nf), jnp.float32) * 0.05    # torch Linear (out, in)
    w_fc_sn = spectral_normalize(w_fc, keys[ki + 1])
    b_fc = jax.random.normal(keys[ki + 2], (1, 128), jnp.float32) * 0.05
    l_y = jax.random.uniform(keys[ki + 3], (num_classes, 128), jnp.float32)  # .uniform_()
    lyn = jnp.sqrt(jnp.sum(l_y * l_y, axis=1)).reshape(1, num_classes)   # class-embedding norms
    return {
        "convs": convs,
        "w_fc": w_fc_sn.T.astype(jnp.bfloat16),        # (nf, 128) bf16 MXU operand
        "b_fc": b_fc,
        "l_y": l_y,
        "lyn": lyn,
    }


def mask_discriminator_forward(bbox, y, params, instance_threshold):
    """bbox: (b, o, w, h) float32 masks; y: (b, o) int32 class ids."""
    b, o, w, h = bbox.shape
    x = bbox.reshape(b * o, w, h, 1).astype(jnp.float32)    # NHWC, Cin = 1
    for (w_flat, bias, do_norm, cout) in params["convs"]:
        x = conv_lrelu_layer(x, w_flat, bias, do_norm, cout)
    n, oh, ow, cf = x.shape
    feat = x.reshape(n, oh * ow, cf)
    return tail_loss(feat, y, params, instance_threshold)


if __name__ == "__main__":
    key = jax.random.PRNGKey(0)
    kp, kx, ky = jax.random.split(key, 3)

    num_classes = 10
    instance_threshold = 5
    b, o, w, h = 2, 2, 16, 16          # spatial 16 -> 9 -> 5 -> 3 -> 2

    params = init_params(kp, num_classes)
    bbox = jax.random.normal(kx, (b, o, w, h), jnp.float32)
    y = jax.random.randint(ky, (b, o), 0, num_classes, dtype=jnp.int32)

    loss = mask_discriminator_forward(bbox, y, params, instance_threshold)
    jax.block_until_ready(loss)
    print("KERNEL_OK")
</pallas_src>

<mosaic_0001>
module attributes {stable_mosaic.version = 11 : i64} {
  func.func @_conv_block_kernel(%arg0: i32, %arg1: memref<192x16xbf16, #tpu.memory_space<vmem>>, %arg2: memref<16x128xbf16, #tpu.memory_space<vmem>>, %arg3: memref<1x128xf32, #tpu.memory_space<vmem>>, %arg4: memref<192x128xf32, #tpu.memory_space<vmem>>) attributes {dimension_semantics = [#tpu.dimension_semantics<parallel>], iteration_bounds = array<i64: 2>, scalar_prefetch = 0 : i64, scratch_operands = 0 : i64, tpu.core_type = #tpu.core_type<tc>, window_params = [{transform_indices = @transform_0, window_bounds = array<i64: 192, 16>}, {pipeline_mode = #tpu.pipeline_mode<synchronous>, transform_indices = @transform_1, window_bounds = array<i64: 16, 128>}, {pipeline_mode = #tpu.pipeline_mode<synchronous>, transform_indices = @transform_2, window_bounds = array<i64: 1, 128>}, {transform_indices = @transform_3, window_bounds = array<i64: 192, 128>}]} {
    %c0 = arith.constant 0 : index
    %c0_0 = arith.constant 0 : index
    %0 = vector.load %arg1[%c0, %c0_0] : memref<192x16xbf16, #tpu.memory_space<vmem>>, vector<192x16xbf16>
    %c0_1 = arith.constant 0 : index
    %c0_2 = arith.constant 0 : index
    %1 = vector.load %arg2[%c0_1, %c0_2] : memref<16x128xbf16, #tpu.memory_space<vmem>>, vector<16x128xbf16>
    %cst = arith.constant dense<0.000000e+00> : vector<192x128xf32>
    %2 = tpu.matmul %0, %1, %cst {dimension_numbers = #tpu.dot_dimension_numbers<[1], [0], [0], [1], [0, 0, 1, 1], [], []>} : vector<192x16xbf16>, vector<16x128xbf16>, vector<192x128xf32> -> vector<192x128xf32>
    %c0_3 = arith.constant 0 : index
    %c0_4 = arith.constant 0 : index
    %3 = vector.load %arg3[%c0_3, %c0_4] : memref<1x128xf32, #tpu.memory_space<vmem>>, vector<1x128xf32>
    %4 = vector.broadcast %3 : vector<1x128xf32> to vector<192x128xf32>
    %5 = arith.addf %2, %4 : vector<192x128xf32>
    %cst_5 = arith.constant 2.000000e-01 : f32
    %6 = vector.broadcast %cst_5 : f32 to vector<192x128xf32>
    %7 = arith.mulf %6, %5 : vector<192x128xf32>
    %8 = arith.maximumf %5, %7 : vector<192x128xf32>
    %c0_6 = arith.constant 0 : index
    %c0_7 = arith.constant 0 : index
    %9 = vector.load %arg4[%c0_6, %c0_7] : memref<192x128xf32, #tpu.memory_space<vmem>>, vector<192x128xf32>
    tpu.vector_store %arg4[%c0_6, %c0_7], %8 {strides = array<i32>} : memref<192x128xf32, #tpu.memory_space<vmem>>, vector<192x128xf32>,
    return
  }
  func.func @transform_0(%arg0: i32) -> (i32, i32) {
    %c0_i32 = arith.constant 0 : i32
    %c0_i32_0 = arith.constant 0 : i32
    return %arg0, %c0_i32 : i32, i32
  }
  func.func @transform_1(%arg0: i32) -> (i32, i32) {
    %c0_i32 = arith.constant 0 : i32
    %c0_i32_0 = arith.constant 0 : i32
    %c0_i32_1 = arith.constant 0 : i32
    return %c0_i32, %c0_i32_0 : i32, i32
  }
  func.func @transform_2(%arg0: i32) -> (i32, i32) {
    %c0_i32 = arith.constant 0 : i32
    %c0_i32_0 = arith.constant 0 : i32
    %c0_i32_1 = arith.constant 0 : i32
    return %c0_i32, %c0_i32_0 : i32, i32
  }
  func.func @transform_3(%arg0: i32) -> (i32, i32) {
    %c0_i32 = arith.constant 0 : i32
    %c0_i32_0 = arith.constant 0 : i32
    return %arg0, %c0_i32 : i32, i32
  }
}

</mosaic_0001>

<bundles_post_ra>
// kernel: tpu_custom_call.1
= control target key start
LH: loop header
LB: loop body
LE: loop exit
PB: predicated region body
PF: predicated region fallthrough
CT: control target
= control target key end

     0   :  { %8 = vsyncpa [#allocation3], 0  ;;  %s981_s0 = inlined_call_operand.vmem [shape: bf16[384,16], index: 0, kind: input, shape index: {}]   ;;  %s982_s1 = inlined_call_operand.vmem [shape: bf16[16,128], index: 1, kind: input, shape index: {}]   ;;  %s983_s2 = inlined_call_operand.vmem [shape: f32[1,128], index: 2, kind: input, shape index: {}]   ;;  %s984_s3 = inlined_call_operand.hbm [shape: f32[384,128], index: 3, kind: output, shape index: {}]  }
   0x1   :  { %10 = vsyncpa [#allocation3 + $0x1], 0  ;;  %s804_s12 = smov 0   ;;  %s806_s13 = smov 0  }
   0x2   :  { %s808_s14 = smov 0   ;;  %s810_s15 = smov 0  }
   0x3 LB: > { %s825_s16 = sadd.s32 4294967295, %s779_s15   ;;  %s586_s17 = sadd.s32 4294967294, %s779_s15   ;;  %s779_s15 = sphi %s810_s15, %s990_s15   ;;  %s775_s14 = sphi %s808_s14, %s989_s14   ;;  %s771_s13 = sphi %s806_s13, %s988_s13   ;;  %s767_s12 = sphi %s804_s12, %s987_s12  }
   0x4   : > { %s829_s18 = sadd.s32 1, %s779_s15   ;;  %s91_s19 = sadd.s32 1, %s775_s14 }
   0x5   : > { %s88_s20 = ssub.s32 %s779_s15, %s829_s18  ;;  %p101_p0 = scmp.ne.s32.totalorder %s775_s14, %s771_s13 }
   0x6   : > { %p89_p1 = scmp.eq.s32.totalorder %s88_s20, 0  ;;  %p102_p2 = scmp.eq.s32.totalorder %s825_s16, 1 }
   0x7   : > { %p107_p3 = scmp.ne.s32.totalorder %s771_s13, %s767_s12  ;;  %p108_p4 = scmp.eq.s32.totalorder %s586_s17, 1 }
   0x8   : > { %s840_s21 = scalar_select %p89_p1, %s775_s14, %s91_s19  }
   0x9   : > { %p842_p5 = por %p102_p2, %p101_p0  ;;  %p846_p6 = por %p108_p4, %p107_p3 }
   0xa   : > { %p589_p7 = scmp.ge.s32.totalorder %s779_s15, 1  ;;  %p141_p8 = scmp.lt.s32.totalorder %s779_s15, 3 }
   0xc   : > { %p142_p9 = pnand %p589_p7, %p141_p8 }
   0xd   : > { %v704_v0 = vld [vmem:[%s982_s1] sm:$0xff] (!%p142_p9)   ;;  %s165_s26 = smul.u32 (!%p142_p9), 24, %s825_s16  ;;  %vm272_vm0 = vcmask (!%p142_p9), 130048   ;;  %s162_s4 = sand.u32 (!%p142_p9), 1, %s771_s13  }
   0xe   : > { %145 = sbr.rel (%p142_p9) target bundleno = 278 (0x116), region = 32  ;;  %634 = vmatprep.subr.bf16.mxu0 (!%p142_p9), %v704_v0  ;;  %660 = vmatprep.subr.bf16.mxu1 (!%p142_p9), %v704_v0  ;;  %v875_v13 = vld [vmem:[%s983_s2] ss:$0 sm:$0xff] (!%p142_p9)  ;;  %s940_s19 = scalar_lea.sflag (!%p142_p9), [#allocation3], %s162_s4 }
   0xf   : > { %p166_p10 = scmp.lt.s32.totalorder (!%p142_p9), %s165_s26, 47  ;;  %635 = vmatpush3.bf16.msra.mxu0 (!%p142_p9), %v704_v0  ;;  %661 = vmatpush3.bf16.msra.mxu1 (!%p142_p9), %v704_v0  ;;  %s662_s7 = smul.u32 (!%p142_p9), 192, %s162_s4 }
  0x10   : > { %s620_s9 = smul.u32 (!%p142_p9), 3072, %s825_s16  ;;  %s781_s24 = smov (!%p142_p9), [#allocation2]  }
  0x11   : > { %s887_s8 = scalar_lea.vmem (!%p142_p9), [#allocation2], %s662_s7  ;;  %s721_s25 = sshll.u32 (!%p142_p9), %s781_s24, 4  ;;  %s722_s25 = int_to_ptr.vmem [resolvable:$false] %s721_s25 }
  0x12   : > { %s524_s10 = sshll.u32 (!%p142_p9), %s887_s8, 4  ;;  %s929_s17 = scalar_lea.hbm (!%p142_p9), %s984_s3, %s620_s9  ;;  %s931_s10 = int_to_ptr.vmem [resolvable:$true] %s524_s10 }
  0x13   : > { %s717_s20 = scalar_lea.vmem (!%p142_p9), %s931_s10, 3072  ;;  %p724_p0 = scmp.lt.s32.totalorder (!%p142_p9), %s931_s10, %s722_s25 }
  0x14   : > { %p718_p11 = scmp.ne.s32.totalorder (!%p142_p9), %s931_s10, %s717_s20 }
  0x15   : > { %s992_s26 = smov (!%p166_p10, %s165_s26), 47 }
  0x16   : > { %s590_s27 = sshll.u32 %s992_s26, 2  ;;  %p719_p12 = pnand %p718_p11, %p842_p5 }
  0x17   : > { %s169_s30 = scalar_lea.vmem %s981_s0, %s590_s27  ;;  %s723_s26 = scalar_lea.vmem %s722_s25, 6144 }
  0x18   : > { %v705_v1 = vld [vmem:[%s169_s30] sm:$0xff]   ;;  %v706_v2 = vld [vmem:[%s169_s30 + $0x30] sm:$0xff]   ;;  %v707_v3 = vld [vmem:[%s169_s30 + $0x8] sm:$0xff]   ;;  %p720_p13 = pneg %p719_p12  ;;  %p725_p1 = scmp.lt.s32.totalorder %s723_s26, %s717_s20 }
  0x19   : > { %636 = vmatprep.mubr.msk.bf16.mxu0 %vm272_vm0, %v705_v1  ;;  %648 = vmatprep.mubr.msk.bf16.mxu1 %vm272_vm0, %v706_v2  ;;  %v708_v4 = vld [vmem:[%s169_s30 + $0x38] sm:$0xff]   ;;  %v709_v5 = vld [vmem:[%s169_s30 + $0x10] sm:$0xff]   ;;  %v710_v6 = vld [vmem:[%s169_s30 + $0x40] sm:$0xff]  }
  0x1a   : > { %637 = vmatmul.mubr.msk.bf16.vlgmr.msra.gmra.mrb[0].mxu0 %vm272_vm0, %v707_v3  ;;  %649 = vmatmul.mubr.msk.bf16.vlgmr.msra.gmra.mrb[0].mxu1 %vm272_vm0, %v708_v4  ;;  %v711_v7 = vld [vmem:[%s169_s30 + $0x18] sm:$0xff]   ;;  %v712_v8 = vld [vmem:[%s169_s30 + $0x48] sm:$0xff]   ;;  %v713_v9 = vld [vmem:[%s169_s30 + $0x20] sm:$0xff]   ;;  %p726_p2 = por %p725_p1, %p724_p0 }
  0x1b   : > { %640 = vmatprep.mubr.msk.bf16.mxu0 %vm272_vm0, %v709_v5  ;;  %652 = vmatprep.mubr.msk.bf16.mxu1 %vm272_vm0, %v710_v6  ;;  %v714_v10 = vld [vmem:[%s169_s30 + $0x50] sm:$0xff]   ;;  %v715_v11 = vld [vmem:[%s169_s30 + $0x28] sm:$0xff]   ;;  %v716_v12 = vld [vmem:[%s169_s30 + $0x58] sm:$0xff]  }
  0x1c   : > { %p727_p3 = pnand %p726_p2, %p720_p13 }
  0x22   : > { %641 = vmatmul.mubr.msk.bf16.gmra.mrb[4].mxu0 %vm272_vm0, %v711_v7  ;;  %653 = vmatmul.mubr.msk.bf16.gmra.mrb[4].mxu1 %vm272_vm0, %v712_v8 }
  0x23   : > { %644 = vmatprep.mubr.msk.bf16.mxu0 %vm272_vm0, %v713_v9  ;;  %656 = vmatprep.mubr.msk.bf16.mxu1 %vm272_vm0, %v714_v10 }
  0x2a   : > { %645 = vmatmul.mubr.msk.bf16.gmra.mrb[8].mxu0 %vm272_vm0, %v715_v11  ;;  %657 = vmatmul.mubr.msk.bf16.gmra.mrb[8].mxu1 %vm272_vm0, %v716_v12 }
  0xed   : > { %v638_v14 = vpop.f32.mrb[0].mxu0  ;;  %v650_v16 = vpop.f32.mrb[0].mxu1 }
  0xee   : > { %v352_v15 = vadd.f32 %v638_v14, %v875_v13  ;;  %v343_v17 = vpop.f32.mrb[1].mxu0  ;;  %v400_v18 = vadd.f32 %v650_v16, %v875_v13  ;;  %v391_v20 = vpop.f32.mrb[1].mxu1 }
  0xef   : > { %v344_v19 = vadd.f32 %v875_v13, %v343_v17  ;;  %v639_v21 = vpop.f32.mrb[2].mxu0  ;;  %v392_v23 = vadd.f32 %v875_v13, %v391_v20  ;;  %v651_v25 = vpop.f32.mrb[2].mxu1 }
  0xf0   : > { %v440_v22 = vmul.f32 0.2, %v352_v15  ;;  %v355_v24 = vadd.f32 %v639_v21, %v875_v13  ;;  %v346_v26 = vpop.f32.mrb[3].mxu0  ;;  %v452_v27 = vmul.f32 0.2, %v400_v18  ;;  %v403_v29 = vadd.f32 %v651_v25, %v875_v13  ;;  %v394_v31 = vpop.f32.mrb[3].mxu1 }
  0xf1   : > { %v438_v28 = vmul.f32 0.2, %v344_v19  ;;  %v347_v30 = vadd.f32 %v875_v13, %v346_v26  ;;  %v450_v33 = vmul.f32 0.2, %v392_v23  ;;  %v395_v35 = vadd.f32 %v875_v13, %v394_v31 }
  0xf2   : > { %v464_v32 = vmax.f32 %v352_v15, %v440_v22  ;;  %v441_v34 = vmul.f32 0.2, %v355_v24  ;;  %v476_v36 = vmax.f32 %v400_v18, %v452_v27  ;;  %v453_v38 = vmul.f32 0.2, %v403_v29 }
  0xf3   : > { %v462_v37 = vmax.f32 %v344_v19, %v438_v28  ;;  %v439_v39 = vmul.f32 0.2, %v347_v30  ;;  %v474_v40 = vmax.f32 %v392_v23, %v450_v33  ;;  %v451_v42 = vmul.f32 0.2, %v395_v35 }
  0xf4   : > { %488 = vst [vmem:[%s887_s8 + $0x10] sm:$0xff] %v464_v32  ;;  %v465_v41 = vmax.f32 %v355_v24, %v441_v34  ;;  %500 = vst [vmem:[%s887_s8 + $0x70] sm:$0xff] %v476_v36  ;;  %v477_v43 = vmax.f32 %v403_v29, %v453_v38 }
  0xf5   : > { %486 = vst [vmem:[%s887_s8] sm:$0xff] %v462_v37  ;;  %v463_v44 = vmax.f32 %v347_v30, %v439_v39  ;;  %v642_v45 = vpop.f32.mrb[4].mxu0  ;;  %498 = vst [vmem:[%s887_s8 + $0x60] sm:$0xff] %v474_v40  ;;  %v475_v46 = vmax.f32 %v395_v35, %v451_v42  ;;  %v654_v48 = vpop.f32.mrb[4].mxu1 }
  0xf6   : > { %489 = vst [vmem:[%s887_s8 + $0x18] sm:$0xff] %v465_v41  ;;  %v368_v47 = vadd.f32 %v642_v45, %v875_v13  ;;  %v359_v49 = vpop.f32.mrb[5].mxu0  ;;  %501 = vst [vmem:[%s887_s8 + $0x78] sm:$0xff] %v477_v43  ;;  %v416_v50 = vadd.f32 %v654_v48, %v875_v13  ;;  %v407_v52 = vpop.f32.mrb[5].mxu1 }
  0xf7   : > { %487 = vst [vmem:[%s887_s8 + $0x8] sm:$0xff] %v463_v44  ;;  %v360_v51 = vadd.f32 %v875_v13, %v359_v49  ;;  %v643_v53 = vpop.f32.mrb[6].mxu0  ;;  %499 = vst [vmem:[%s887_s8 + $0x68] sm:$0xff] %v475_v46  ;;  %v408_v55 = vadd.f32 %v875_v13, %v407_v52  ;;  %v655_v57 = vpop.f32.mrb[6].mxu1 }
  0xf8   : > { %v444_v54 = vmul.f32 0.2, %v368_v47  ;;  %v371_v56 = vadd.f32 %v643_v53, %v875_v13  ;;  %v362_v58 = vpop.f32.mrb[7].mxu0  ;;  %v456_v59 = vmul.f32 0.2, %v416_v50  ;;  %v419_v61 = vadd.f32 %v655_v57, %v875_v13  ;;  %v410_v63 = vpop.f32.mrb[7].mxu1 }
  0xf9   : > { %v442_v60 = vmul.f32 0.2, %v360_v51  ;;  %v363_v62 = vadd.f32 %v875_v13, %v362_v58  ;;  %v454_v1 = vmul.f32 0.2, %v408_v55  ;;  %v411_v3 = vadd.f32 %v875_v13, %v410_v63 }
  0xfa   : > { %v468_v0 = vmax.f32 %v368_v47, %v444_v54  ;;  %v445_v2 = vmul.f32 0.2, %v371_v56  ;;  %v480_v4 = vmax.f32 %v416_v50, %v456_v59  ;;  %v457_v6 = vmul.f32 0.2, %v419_v61 }
  0xfb   : > { %v466_v5 = vmax.f32 %v360_v51, %v442_v60  ;;  %v443_v7 = vmul.f32 0.2, %v363_v62  ;;  %v478_v8 = vmax.f32 %v408_v55, %v454_v1  ;;  %v455_v10 = vmul.f32 0.2, %v411_v3 }
  0xfc   : > { %492 = vst [vmem:[%s887_s8 + $0x30] sm:$0xff] %v468_v0  ;;  %v469_v9 = vmax.f32 %v371_v56, %v445_v2  ;;  %504 = vst [vmem:[%s887_s8 + $0x90] sm:$0xff] %v480_v4  ;;  %v481_v11 = vmax.f32 %v419_v61, %v457_v6 }
  0xfd   : > { %490 = vst [vmem:[%s887_s8 + $0x20] sm:$0xff] %v466_v5  ;;  %v467_v12 = vmax.f32 %v363_v62, %v443_v7  ;;  %v646_v14 = vpop.f32.mrb[8].mxu0  ;;  %502 = vst [vmem:[%s887_s8 + $0x80] sm:$0xff] %v478_v8  ;;  %v479_v15 = vmax.f32 %v411_v3, %v455_v10  ;;  %v658_v17 = vpop.f32.mrb[8].mxu1 }
  0xfe   : > { %493 = vst [vmem:[%s887_s8 + $0x38] sm:$0xff] %v469_v9  ;;  %v384_v16 = vadd.f32 %v646_v14, %v875_v13  ;;  %v375_v18 = vpop.f32.mrb[9].mxu0  ;;  %505 = vst [vmem:[%s887_s8 + $0x98] sm:$0xff] %v481_v11  ;;  %v432_v19 = vadd.f32 %v658_v17, %v875_v13  ;;  %v423_v21 = vpop.f32.mrb[9].mxu1 }
  0xff   : > { %491 = vst [vmem:[%s887_s8 + $0x28] sm:$0xff] %v467_v12  ;;  %v376_v20 = vadd.f32 %v875_v13, %v375_v18  ;;  %v647_v22 = vpop.f32.mrb[10].mxu0  ;;  %503 = vst [vmem:[%s887_s8 + $0x88] sm:$0xff] %v479_v15  ;;  %v424_v24 = vadd.f32 %v875_v13, %v423_v21  ;;  %v659_v26 = vpop.f32.mrb[10].mxu1 }
 0x100   : > { %v448_v23 = vmul.f32 0.2, %v384_v16  ;;  %v387_v25 = vadd.f32 %v647_v22, %v875_v13  ;;  %v378_v27 = vpop.f32.mrb[11].mxu0  ;;  %v460_v28 = vmul.f32 0.2, %v432_v19  ;;  %v435_v30 = vadd.f32 %v659_v26, %v875_v13  ;;  %v426_v32 = vpop.f32.mrb[11].mxu1 }
 0x101   : > { %v446_v29 = vmul.f32 0.2, %v376_v20  ;;  %v379_v31 = vadd.f32 %v875_v13, %v378_v27  ;;  %v458_v34 = vmul.f32 0.2, %v424_v24  ;;  %v427_v36 = vadd.f32 %v875_v13, %v426_v32 }
 0x102   : > { %v472_v33 = vmax.f32 %v384_v16, %v448_v23  ;;  %v449_v35 = vmul.f32 0.2, %v387_v25  ;;  %v484_v37 = vmax.f32 %v432_v19, %v460_v28  ;;  %v461_v39 = vmul.f32 0.2, %v435_v30 }
 0x103   : > { %v470_v38 = vmax.f32 %v376_v20, %v446_v29  ;;  %v447_v40 = vmul.f32 0.2, %v379_v31  ;;  %v482_v41 = vmax.f32 %v424_v24, %v458_v34  ;;  %v459_v43 = vmul.f32 0.2, %v427_v36 }
 0x104   : > { %496 = vst [vmem:[%s887_s8 + $0x50] sm:$0xff] %v472_v33  ;;  %v473_v42 = vmax.f32 %v387_v25, %v449_v35  ;;  %508 = vst [vmem:[%s887_s8 + $0xb0] sm:$0xff] %v484_v37  ;;  %v485_v44 = vmax.f32 %v435_v30, %v461_v39 }
 0x105   : > { %494 = vst [vmem:[%s887_s8 + $0x40] sm:$0xff] %v470_v38  ;;  %v471_v13 = vmax.f32 %v379_v31, %v447_v40  ;;  %506 = vst [vmem:[%s887_s8 + $0xa0] sm:$0xff] %v482_v41  ;;  %v483_v45 = vmax.f32 %v427_v36, %v459_v43 }
 0x106   : > { %497 = vst [vmem:[%s887_s8 + $0x58] sm:$0xff] %v473_v42  ;;  %509 = vst [vmem:[%s887_s8 + $0xb8] sm:$0xff] %v485_v44 }
 0x107   : > { %495 = vst [vmem:[%s887_s8 + $0x48] sm:$0xff] %v471_v13  ;;  %507 = vst [vmem:[%s887_s8 + $0xa8] sm:$0xff] %v483_v45 }
 0x108   : > { %730 = shalt.err (!%p727_p3)
}
 0x109   : > { %s731_s27 = scalar_lea.hbm %s929_s17, 3072  ;;  %s735_s30 = scalar_lea.hbm %s984_s3, 6144 }
 0x10a   : > { %p732_p4 = scmp.ne.s32.totalorder %s929_s17, %s731_s27  ;;  %p736_p9 = scmp.lt.u32.totalorder %s929_s17, %s984_s3 }
 0x10b   : > { %p737_p10 = scmp.lt.u32.totalorder %s735_s30, %s731_s27  ;;  %p739_p12 = scmp.lt.u32.totalorder %s731_s27, %s929_s17 }
 0x10c   : > { %p733_p7 = pnand %p732_p4, %p842_p5 }
 0x10d   : > { %p738_p11 = por %p737_p10, %p736_p9 }
 0x10e   : > { %p734_p8 = pneg %p733_p7 }
 0x10f   : > { %p740_p13 = por %p739_p12, %p738_p11 }
 0x111   : > { %p741_p0 = pnand %p740_p13, %p734_p8 }
 0x113   : > { %744 = shalt.err (!%p741_p0)
}
 0x114   : > { %s782_s6 = smov 128   ;;  %s783_s7 = smov 8  }
 0x115   : > { %663 = dma.vmem_to_hbm [thread:$0]  (%p842_p5), %s931_s10, 3072, %s929_s17, %s940_s19, %s782_s6, %s782_s6, %s783_s7  }
 0x116 PF: > { %p669_p1 = scmp.ge.s32.totalorder %s779_s15, 2  ;;  %s539_s8 = sand.u32 1, %s767_s12  }
 0x117   : > { %s540_s9 = scalar_lea.sflag [#allocation3], %s539_s8 }
 0x118   : > { %p666_p2 = pnand %p669_p1, %p846_p6 }
 0x11a   : > { %762 = dma.done.wait (!%p666_p2), %s540_s9, 3072  }
 0x11b   : > { %764 = vsyncadd (!%p666_p2), %s540_s9, 4294964224  ;;  %p13_p3 = scmp.ge.s32.totalorder %s829_s18, 4   ;;  %s987_s12 = smov %s771_s13 }
 0x11c   : > { %s988_s13 = smov %s775_s14  ;;  %s989_s14 = smov %s840_s21 }
 0x11d   : > { %s990_s15 = smov %s829_s18  ;;  %15 = sbr.rel (!%p13_p3) target bundleno = 3 (0x3), region = 67 }
 0x124   :  { %545 = vsyncpa [#allocation3], 1 }
 0x125   :  { %547 = vsyncpa [#allocation3 + $0x1], 1 }

</bundles_post_ra>
